<compile_context>
chip_gen: v7x
topology: tpu7x:2x2x1
jax: 0.10.0
libtpu: 0.0.40
codegen_flags: <defaults>
</compile_context>

<pallas_src>
import functools
import math

import jax
import jax.numpy as jnp
from jax.experimental import pallas as pl
from jax.experimental.pallas import tpu as pltpu


HID1 = 64
HID2 = 128
_COMPUTE_DTYPE = jnp.bfloat16  # MXU input dtype; accumulation stays fp32


def _round_up(x, m):
    return ((x + m - 1) // m) * m


def _cdiv(a, b):
    return (a + b - 1) // b


def _mlp_kernel(x_ref, w1_ref, b1_ref, w2_ref, b2_ref, w3_ref, b3_ref, o_ref):
    # x_ref : (TM, G*in_dim)  f32 packed points (G points per row); cast here.
    # w*_ref: bf16 block-diagonal kron(I_G, W) weights, VMEM-resident.
    # b*_ref: (1, G*width)    f32 tiled biases.
    # o_ref : (TM, G*out_dim) f32 packed output (full 128 lanes when packed).
    x = x_ref[...].astype(_COMPUTE_DTYPE)
    h1 = jnp.dot(x, w1_ref[...], preferred_element_type=jnp.float32) + b1_ref[...]
    h1 = jnp.maximum(h1, 0.0).astype(_COMPUTE_DTYPE)
    h2 = jnp.dot(h1, w2_ref[...], preferred_element_type=jnp.float32) + b2_ref[...]
    h2 = jnp.maximum(h2, 0.0).astype(_COMPUTE_DTYPE)
    o = jnp.dot(h2, w3_ref[...], preferred_element_type=jnp.float32) + b3_ref[...]
    o_ref[...] = o.astype(o_ref.dtype)


def _pack_linear(w, b, G):
    """Block-diagonal weight kron(I_G, w): a packed row holding G points of
    width `in_features` maps to a packed row of G points of width
    `out_features`.  Weights cast to bf16 for the MXU; biases stay f32."""
    wG = jnp.kron(jnp.eye(G, dtype=w.dtype), w).astype(_COMPUTE_DTYPE)
    bG = jnp.tile(b, (1, G)).astype(jnp.float32)
    return wG, bG


@functools.partial(jax.jit, static_argnames=("tm_points",))
def mlp_point_embedding(x, params, *, tm_points=8192):
    """x: (..., in_dim) float32 -> (..., out_dim) float32."""
    w1, b1, w2, b2, w3, b3 = params
    in_dim = w1.shape[0]
    out_dim = w3.shape[1]

    lead_shape = x.shape[:-1]
    m = math.prod(lead_shape) if lead_shape else 1

    # Lane-packing group: G points share one 128-lane output row.
    G = 128 // out_dim if (out_dim < 128 and 128 % out_dim == 0) else 1

    # Packed bf16 weights / tiled f32 biases (tiny arrays, built per call).
    w1G, b1G = _pack_linear(w1, b1, G)
    w2G, b2G = _pack_linear(w2, b2, G)
    w3G, b3G = _pack_linear(w3, b3, G)

    # Pad only up to the packing/sublane alignment (8*G rows): aligned sizes
    # never pay a full-array pad/copy.  Partial edge blocks handle a
    # non-dividing grid; the tail is sliced off at the end.
    align = 8 * G
    m_pad = _round_up(m, align)
    x2d = x.reshape(m, in_dim).astype(jnp.float32)
    if m_pad != m:
        x2d = jnp.pad(x2d, ((0, m_pad - m), (0, 0)))

    n_rows = m_pad // G                          # packed rows (multiple of 8)
    x_packed = x2d.reshape(n_rows, G * in_dim)   # free contiguous reshape

    win = G * in_dim
    w1o = G * HID1
    w2o = G * HID2
    wout = G * out_dim

    # Row-tile selection: as many points per grid step as a VMEM budget allows
    # (amortizes ~0.35 us per-step pipeline overhead), capped by tm_points.
    # Rough per-row VMEM bytes: x f32 (x2 buffers), h1/h2 f32 + bf16 copies,
    # output f32 (x2 buffers).
    per_row_bytes = 8 * win + 6 * (w1o + w2o) + 8 * wout
    vmem_budget = 24 * 1024 * 1024
    tm = max(8, (tm_points // G) // 8 * 8)
    tm = min(tm, max(8, (vmem_budget // per_row_bytes) // 8 * 8))
    tm = min(tm, n_rows)
    # Keep >= 2 grid steps when possible so ("parallel",) can shard across both
    # TensorCores on v7x.
    if n_rows >= 16 and _cdiv(n_rows, tm) < 2:
        tm = _round_up(_cdiv(n_rows, 2), 8)
    grid = (_cdiv(n_rows, tm),)

    out_packed = pl.pallas_call(
        _mlp_kernel,
        out_shape=jax.ShapeDtypeStruct((n_rows, wout), jnp.float32),
        grid_spec=pltpu.PrefetchScalarGridSpec(
            num_scalar_prefetch=0,
            grid=grid,
            in_specs=[
                pl.BlockSpec((tm, win), lambda i: (i, 0)),    # packed point rows
                pl.BlockSpec((win, w1o), lambda i: (0, 0)),   # kron(I_G, w1)
                pl.BlockSpec((1, w1o), lambda i: (0, 0)),     # b1 (tiled)
                pl.BlockSpec((w1o, w2o), lambda i: (0, 0)),   # kron(I_G, w2)
                pl.BlockSpec((1, w2o), lambda i: (0, 0)),     # b2 (tiled)
                pl.BlockSpec((w2o, wout), lambda i: (0, 0)),  # kron(I_G, w3)
                pl.BlockSpec((1, wout), lambda i: (0, 0)),    # b3 (tiled)
            ],
            out_specs=pl.BlockSpec((tm, wout), lambda i: (i, 0)),
        ),
        compiler_params=pltpu.CompilerParams(
            dimension_semantics=("parallel",),
            vmem_limit_bytes=32 * 1024 * 1024,
        ),
    )(x_packed, w1G, b1G, w2G, b2G, w3G, b3G)

    # Free contiguous un-packing view + slice off any padded tail rows.
    out = out_packed.reshape(m_pad, out_dim)[:m]
    return out.reshape(*lead_shape, out_dim)


def init_params(key, in_dim, out_dim):
    """Deterministic init mimicking nn.Linear defaults (uniform +/-1/sqrt(fan_in)).

    Weights stored transposed: (in_features, out_features); biases (1, out).
    Kept fp32 at the interface (matching the PyTorch module); the wrapper casts
    weights to bf16 for the MXU."""
    dims = [(in_dim, HID1), (HID1, HID2), (HID2, out_dim)]
    params = []
    for (fan_in, fan_out) in dims:
        key, kw, kb = jax.random.split(key, 3)
        bound = 1.0 / (fan_in ** 0.5)
        w = jax.random.uniform(kw, (fan_in, fan_out), jnp.float32, -bound, bound)
        b = jax.random.uniform(kb, (1, fan_out), jnp.float32, -bound, bound)
        params.extend([w, b])
    return tuple(params)


def reference_mlp(x, params):
    w1, b1, w2, b2, w3, b3 = params
    h1 = jnp.maximum(x @ w1 + b1[0], 0.0)
    h2 = jnp.maximum(h1 @ w2 + b2[0], 0.0)
    return h2 @ w3 + b3[0]


if __name__ == "__main__":
    key = jax.random.PRNGKey(0)
    in_dim, out_dim = 4, 32
    B, N = 2, 8  # 2 batches of 8 points, each point has in_dim features

    key, kx, kp = jax.random.split(key, 3)
    x = jax.random.normal(kx, (B, N, in_dim), jnp.float32)
    params = init_params(kp, in_dim, out_dim)

    out = jax.block_until_ready(mlp_point_embedding(x, params))
    ref = reference_mlp(x.reshape(-1, in_dim), params).reshape(B, N, out_dim)
    assert out.shape == (B, N, out_dim), out.shape
    # bf16 matmul inputs with fp32 accumulation -> relaxed tolerance vs fp32 ref.
    assert jnp.allclose(out, ref, atol=2e-2, rtol=2e-2), float(jnp.max(jnp.abs(out - ref)))

    # Ragged point count: exercises the small tail pad + multi-step (partial) grid.
    x2 = jax.random.normal(key, (3, 50, in_dim), jnp.float32)
    out2 = jax.block_until_ready(mlp_point_embedding(x2, params))
    ref2 = reference_mlp(x2.reshape(-1, in_dim), params).reshape(3, 50, out_dim)
    assert out2.shape == (3, 50, out_dim), out2.shape
    assert jnp.allclose(out2, ref2, atol=2e-2, rtol=2e-2), float(jnp.max(jnp.abs(out2 - ref2)))

    print("KERNEL_OK")
</pallas_src>

<mosaic_0001>
module attributes {stable_mosaic.version = 11 : i64} {
  func.func @_mlp_kernel(%arg0: i32, %arg1: memref<8x16xf32, #tpu.memory_space<vmem>>, %arg2: memref<16x256xbf16, #tpu.memory_space<vmem>>, %arg3: memref<1x256xf32, #tpu.memory_space<vmem>>, %arg4: memref<256x512xbf16, #tpu.memory_space<vmem>>, %arg5: memref<1x512xf32, #tpu.memory_space<vmem>>, %arg6: memref<512x128xbf16, #tpu.memory_space<vmem>>, %arg7: memref<1x128xf32, #tpu.memory_space<vmem>>, %arg8: memref<8x128xf32, #tpu.memory_space<vmem>>) attributes {dimension_semantics = [#tpu.dimension_semantics<parallel>], iteration_bounds = array<i64: 1>, scalar_prefetch = 0 : i64, scratch_operands = 0 : i64, tpu.core_type = #tpu.core_type<tc>, window_params = [{transform_indices = @transform_0, window_bounds = array<i64: 8, 16>}, {pipeline_mode = #tpu.pipeline_mode<synchronous>, transform_indices = @transform_1, window_bounds = array<i64: 16, 256>}, {pipeline_mode = #tpu.pipeline_mode<synchronous>, transform_indices = @transform_2, window_bounds = array<i64: 1, 256>}, {pipeline_mode = #tpu.pipeline_mode<synchronous>, transform_indices = @transform_3, window_bounds = array<i64: 256, 512>}, {pipeline_mode = #tpu.pipeline_mode<synchronous>, transform_indices = @transform_4, window_bounds = array<i64: 1, 512>}, {pipeline_mode = #tpu.pipeline_mode<synchronous>, transform_indices = @transform_5, window_bounds = array<i64: 512, 128>}, {pipeline_mode = #tpu.pipeline_mode<synchronous>, transform_indices = @transform_6, window_bounds = array<i64: 1, 128>}, {transform_indices = @transform_7, window_bounds = array<i64: 8, 128>}]} {
    %c0 = arith.constant 0 : index
    %c0_0 = arith.constant 0 : index
    %0 = vector.load %arg1[%c0, %c0_0] : memref<8x16xf32, #tpu.memory_space<vmem>>, vector<8x16xf32>
    %1 = arith.truncf %0 : vector<8x16xf32> to vector<8x16xbf16>
    %c0_1 = arith.constant 0 : index
    %c0_2 = arith.constant 0 : index
    %2 = vector.load %arg2[%c0_1, %c0_2] : memref<16x256xbf16, #tpu.memory_space<vmem>>, vector<16x256xbf16>
    %cst = arith.constant dense<0.000000e+00> : vector<8x256xf32>
    %3 = tpu.matmul %1, %2, %cst {dimension_numbers = #tpu.dot_dimension_numbers<[1], [0], [0], [1], [0, 0, 1, 1], [], []>} : vector<8x16xbf16>, vector<16x256xbf16>, vector<8x256xf32> -> vector<8x256xf32>
    %c0_3 = arith.constant 0 : index
    %c0_4 = arith.constant 0 : index
    %4 = vector.load %arg3[%c0_3, %c0_4] : memref<1x256xf32, #tpu.memory_space<vmem>>, vector<1x256xf32>
    %5 = vector.broadcast %4 : vector<1x256xf32> to vector<8x256xf32>
    %6 = arith.addf %3, %5 : vector<8x256xf32>
    %cst_5 = arith.constant 0.000000e+00 : f32
    %7 = vector.broadcast %cst_5 : f32 to vector<8x256xf32>
    %8 = arith.maximumf %6, %7 : vector<8x256xf32>
    %9 = arith.truncf %8 : vector<8x256xf32> to vector<8x256xbf16>
    %c0_6 = arith.constant 0 : index
    %c0_7 = arith.constant 0 : index
    %10 = vector.load %arg4[%c0_6, %c0_7] : memref<256x512xbf16, #tpu.memory_space<vmem>>, vector<256x512xbf16>
    %cst_8 = arith.constant dense<0.000000e+00> : vector<8x512xf32>
    %11 = tpu.matmul %9, %10, %cst_8 {dimension_numbers = #tpu.dot_dimension_numbers<[1], [0], [0], [1], [0, 0, 1, 1], [], []>} : vector<8x256xbf16>, vector<256x512xbf16>, vector<8x512xf32> -> vector<8x512xf32>
    %c0_9 = arith.constant 0 : index
    %c0_10 = arith.constant 0 : index
    %12 = vector.load %arg5[%c0_9, %c0_10] : memref<1x512xf32, #tpu.memory_space<vmem>>, vector<1x512xf32>
    %13 = vector.broadcast %12 : vector<1x512xf32> to vector<8x512xf32>
    %14 = arith.addf %11, %13 : vector<8x512xf32>
    %cst_11 = arith.constant 0.000000e+00 : f32
    %15 = vector.broadcast %cst_11 : f32 to vector<8x512xf32>
    %16 = arith.maximumf %14, %15 : vector<8x512xf32>
    %17 = arith.truncf %16 : vector<8x512xf32> to vector<8x512xbf16>
    %c0_12 = arith.constant 0 : index
    %c0_13 = arith.constant 0 : index
    %18 = vector.load %arg6[%c0_12, %c0_13] : memref<512x128xbf16, #tpu.memory_space<vmem>>, vector<512x128xbf16>
    %cst_14 = arith.constant dense<0.000000e+00> : vector<8x128xf32>
    %19 = tpu.matmul %17, %18, %cst_14 {dimension_numbers = #tpu.dot_dimension_numbers<[1], [0], [0], [1], [0, 0, 1, 1], [], []>} : vector<8x512xbf16>, vector<512x128xbf16>, vector<8x128xf32> -> vector<8x128xf32>
    %c0_15 = arith.constant 0 : index
    %c0_16 = arith.constant 0 : index
    %20 = vector.load %arg7[%c0_15, %c0_16] : memref<1x128xf32, #tpu.memory_space<vmem>>, vector<1x128xf32>
    %21 = vector.broadcast %20 : vector<1x128xf32> to vector<8x128xf32>
    %22 = arith.addf %19, %21 : vector<8x128xf32>
    %c0_17 = arith.constant 0 : index
    %c0_18 = arith.constant 0 : index
    %23 = vector.load %arg8[%c0_17, %c0_18] : memref<8x128xf32, #tpu.memory_space<vmem>>, vector<8x128xf32>
    tpu.vector_store %arg8[%c0_17, %c0_18], %22 {strides = array<i32>} : memref<8x128xf32, #tpu.memory_space<vmem>>, vector<8x128xf32>,
    return
  }
  func.func @transform_0(%arg0: i32) -> (i32, i32) {
    %c0_i32 = arith.constant 0 : i32
    %c0_i32_0 = arith.constant 0 : i32
    return %arg0, %c0_i32 : i32, i32
  }
  func.func @transform_1(%arg0: i32) -> (i32, i32) {
    %c0_i32 = arith.constant 0 : i32
    %c0_i32_0 = arith.constant 0 : i32
    %c0_i32_1 = arith.constant 0 : i32
    return %c0_i32, %c0_i32_0 : i32, i32
  }
  func.func @transform_2(%arg0: i32) -> (i32, i32) {
    %c0_i32 = arith.constant 0 : i32
    %c0_i32_0 = arith.constant 0 : i32
    %c0_i32_1 = arith.constant 0 : i32
    return %c0_i32, %c0_i32_0 : i32, i32
  }
  func.func @transform_3(%arg0: i32) -> (i32, i32) {
    %c0_i32 = arith.constant 0 : i32
    %c0_i32_0 = arith.constant 0 : i32
    %c0_i32_1 = arith.constant 0 : i32
    return %c0_i32, %c0_i32_0 : i32, i32
  }
  func.func @transform_4(%arg0: i32) -> (i32, i32) {
    %c0_i32 = arith.constant 0 : i32
    %c0_i32_0 = arith.constant 0 : i32
    %c0_i32_1 = arith.constant 0 : i32
    return %c0_i32, %c0_i32_0 : i32, i32
  }
  func.func @transform_5(%arg0: i32) -> (i32, i32) {
    %c0_i32 = arith.constant 0 : i32
    %c0_i32_0 = arith.constant 0 : i32
    %c0_i32_1 = arith.constant 0 : i32
    return %c0_i32, %c0_i32_0 : i32, i32
  }
  func.func @transform_6(%arg0: i32) -> (i32, i32) {
    %c0_i32 = arith.constant 0 : i32
    %c0_i32_0 = arith.constant 0 : i32
    %c0_i32_1 = arith.constant 0 : i32
    return %c0_i32, %c0_i32_0 : i32, i32
  }
  func.func @transform_7(%arg0: i32) -> (i32, i32) {
    %c0_i32 = arith.constant 0 : i32
    %c0_i32_0 = arith.constant 0 : i32
    return %arg0, %c0_i32 : i32, i32
  }
}

</mosaic_0001>

<bundles_post_ra>
// kernel: mlp_point_embedding.1
= control target key start
LH: loop header
LB: loop body
LE: loop exit
PB: predicated region body
PF: predicated region fallthrough
CT: control target
= control target key end

     0   :  { %v1222_v1 = vmov 0   ;;  %vm53_vm0 = vcmask 130048   ;;  %s1586_s1 = inlined_call_operand.vmem [shape: bf16[16,256], index: 1, kind: input, shape index: {}]   ;;  %s1587_s0 = inlined_call_operand.vmem [shape: f32[8,16], index: 0, kind: input, shape index: {}]   ;;  %s1588_s3 = inlined_call_operand.vmem [shape: bf16[256,512], index: 3, kind: input, shape index: {}]   ;;  %s1589_s5 = inlined_call_operand.vmem [shape: bf16[512,128], index: 5, kind: input, shape index: {}]   ;;  %s1590_s2 = inlined_call_operand.vmem [shape: f32[1,256], index: 2, kind: input, shape index: {}]   ;;  %s1591_s4 = inlined_call_operand.vmem [shape: f32[1,512], index: 4, kind: input, shape index: {}]   ;;  %s1592_s6 = inlined_call_operand.vmem [shape: f32[1,128], index: 6, kind: input, shape index: {}]   ;;  %s1593_s7 = inlined_call_operand.vmem [shape: f32[8,128], index: 7, kind: output, shape index: {}]  }
   0x1   :  { %v1091_v0 = vld [vmem:[%s1586_s1 + $0x4] ss:$8 sps:$4 sm:$0xff]   ;;  %89 = vmatprep.mubr.bf16.mxu0 %v1222_v1  ;;  %v1093_v2 = vld [vmem:[%s1586_s1] ss:$8 sps:$4 sm:$0xff]  }
   0x2   :  { %v27_v3 = vld [vmem:[%s1587_s0] sm:$0xff]  ;;  %57 = vmatprep.subr.bf16.mxu0 %v1091_v0  ;;  %v1096_v6 = vld [vmem:[%s1588_s3 + $0x8] ss:$16 sps:$4 sm:$0xff]   ;;  %v1098_v7 = vld [vmem:[%s1588_s3 + $0xc] ss:$16 sps:$4 sm:$0xff]  }
   0x3   :  { %v28_v4 = vpack.c.bf16 %v27_v3, %v27_v3  ;;  %v1094_v5 = vld [vmem:[%s1588_s3 + $0x4] ss:$16 sps:$4 sm:$0xff]   ;;  %58 = vmatpush1.bf16.msra.mxu0 %v1093_v2  ;;  %v1099_v8 = vld [vmem:[%s1588_s3] ss:$16 sps:$4 sm:$0xff]   ;;  %v1102_v10 = vld [vmem:[%s1588_s3 + $0x28] ss:$16 sps:$4 sm:$0xff]  }
   0x4   :  { %508 = vmatprep.subr.bf16.mxu1 %v1094_v5  ;;  %549 = vmatprep.subr.bf16.mxu0 %v1098_v7  ;;  %v1100_v9 = vld [vmem:[%s1588_s3 + $0x24] ss:$16 sps:$4 sm:$0xff]   ;;  %v1104_v11 = vld [vmem:[%s1588_s3 + $0x2c] ss:$16 sps:$4 sm:$0xff]   ;;  %v1105_v12 = vld [vmem:[%s1588_s3 + $0x20] ss:$16 sps:$4 sm:$0xff]   ;;  %v33_v7 = vlaneseq }
   0x5   :  { %509 = vmatpush1.bf16.msra.mxu1 %v1099_v8  ;;  %v1106_v13 = vld [vmem:[%s1588_s3 + $0x44] ss:$16 sps:$4 sm:$0xff]   ;;  %v1110_v14 = vld [vmem:[%s1588_s3 + $0x4c] ss:$16 sps:$4 sm:$0xff]   ;;  %v1111_v15 = vld [vmem:[%s1588_s3 + $0x40] ss:$16 sps:$4 sm:$0xff]  }
   0x6   :  { %948 = vmatmul.mubr.msk.bf16.vlgmr.msra.gmra.mrb[0].mxu0 %vm53_vm0, %v28_v4  ;;  %510 = vmatprep.subr.bf16.mxu1 %v1100_v9  ;;  %v1108_v16 = vld [vmem:[%s1588_s3 + $0x48] ss:$16 sps:$4 sm:$0xff]   ;;  %v1112_v17 = vld [vmem:[%s1588_s3 + $0x64] ss:$16 sps:$4 sm:$0xff]   ;;  %v1116_v18 = vld [vmem:[%s1588_s3 + $0x6c] ss:$16 sps:$4 sm:$0xff]  }
   0x7   :  { %550 = vmatpush1.bf16.msra.mxu0 %v1096_v6  ;;  %v1114_v19 = vld [vmem:[%s1588_s3 + $0x68] ss:$16 sps:$4 sm:$0xff]   ;;  %v1117_v20 = vld [vmem:[%s1588_s3 + $0x60] ss:$16 sps:$4 sm:$0xff]   ;;  %v1118_v21 = vld [vmem:[%s1588_s3 + $0x84] ss:$16 sps:$4 sm:$0xff]  }
   0x8   :  { %551 = vmatprep.subr.bf16.mxu0 %v1104_v11  ;;  %v1122_v22 = vld [vmem:[%s1588_s3 + $0x8c] ss:$16 sps:$4 sm:$0xff]   ;;  %v1123_v23 = vld [vmem:[%s1588_s3 + $0x80] ss:$16 sps:$4 sm:$0xff]   ;;  %v1120_v24 = vld [vmem:[%s1588_s3 + $0x88] ss:$16 sps:$4 sm:$0xff]  }
   0x9   :  { %511 = vmatpush1.bf16.msra.mxu1 %v1105_v12  ;;  %v1124_v25 = vld [vmem:[%s1588_s3 + $0xa4] ss:$16 sps:$4 sm:$0xff]   ;;  %v1128_v26 = vld [vmem:[%s1588_s3 + $0xac] ss:$16 sps:$4 sm:$0xff]   ;;  %v1126_v27 = vld [vmem:[%s1588_s3 + $0xa8] ss:$16 sps:$4 sm:$0xff]  }
   0xa   :  { %512 = vmatprep.subr.bf16.mxu1 %v1106_v13  ;;  %v1129_v28 = vld [vmem:[%s1588_s3 + $0xa0] ss:$16 sps:$4 sm:$0xff]   ;;  %v1130_v29 = vld [vmem:[%s1588_s3 + $0xc4] ss:$16 sps:$4 sm:$0xff]   ;;  %v1134_v30 = vld [vmem:[%s1588_s3 + $0xcc] ss:$16 sps:$4 sm:$0xff]  }
   0xb   :  { %552 = vmatpush1.bf16.msra.mxu0 %v1102_v10  ;;  %v1135_v31 = vld [vmem:[%s1588_s3 + $0xc0] ss:$16 sps:$4 sm:$0xff]   ;;  %v1132_v32 = vld [vmem:[%s1588_s3 + $0xc8] ss:$16 sps:$4 sm:$0xff]   ;;  %v1136_v33 = vld [vmem:[%s1588_s3 + $0xe4] ss:$16 sps:$4 sm:$0xff]  }
   0xc   :  { %553 = vmatprep.subr.bf16.mxu0 %v1110_v14  ;;  %v1140_v34 = vld [vmem:[%s1588_s3 + $0xec] ss:$16 sps:$4 sm:$0xff]   ;;  %v1138_v35 = vld [vmem:[%s1588_s3 + $0xe8] ss:$16 sps:$4 sm:$0xff]   ;;  %v1141_v36 = vld [vmem:[%s1588_s3 + $0xe0] ss:$16 sps:$4 sm:$0xff]  }
   0xd   :  { %513 = vmatpush1.bf16.msra.mxu1 %v1111_v15  ;;  %v1142_v37 = vld [vmem:[%s1588_s3 + $0x104] ss:$16 sps:$4 sm:$0xff]   ;;  %v1146_v38 = vld [vmem:[%s1588_s3 + $0x10c] ss:$16 sps:$4 sm:$0xff]   ;;  %v1147_v39 = vld [vmem:[%s1588_s3 + $0x100] ss:$16 sps:$4 sm:$0xff]  }
   0xe   :  { %514 = vmatprep.subr.bf16.mxu1 %v1112_v17  ;;  %v1144_v40 = vld [vmem:[%s1588_s3 + $0x108] ss:$16 sps:$4 sm:$0xff]   ;;  %v1148_v41 = vld [vmem:[%s1588_s3 + $0x124] ss:$16 sps:$4 sm:$0xff]   ;;  %v1152_v42 = vld [vmem:[%s1588_s3 + $0x12c] ss:$16 sps:$4 sm:$0xff]  }
   0xf   :  { %554 = vmatpush1.bf16.msra.mxu0 %v1108_v16  ;;  %v1150_v43 = vld [vmem:[%s1588_s3 + $0x128] ss:$16 sps:$4 sm:$0xff]   ;;  %v1153_v44 = vld [vmem:[%s1588_s3 + $0x120] ss:$16 sps:$4 sm:$0xff]   ;;  %v1154_v45 = vld [vmem:[%s1588_s3 + $0x144] ss:$16 sps:$4 sm:$0xff]  }
  0x10   :  { %555 = vmatprep.subr.bf16.mxu0 %v1116_v18  ;;  %v1158_v46 = vld [vmem:[%s1588_s3 + $0x14c] ss:$16 sps:$4 sm:$0xff]   ;;  %v1159_v47 = vld [vmem:[%s1588_s3 + $0x140] ss:$16 sps:$4 sm:$0xff]   ;;  %v1156_v48 = vld [vmem:[%s1588_s3 + $0x148] ss:$16 sps:$4 sm:$0xff]  }
  0x11   :  { %515 = vmatpush1.bf16.msra.mxu1 %v1117_v20  ;;  %v1160_v49 = vld [vmem:[%s1588_s3 + $0x164] ss:$16 sps:$4 sm:$0xff]   ;;  %v1164_v50 = vld [vmem:[%s1588_s3 + $0x16c] ss:$16 sps:$4 sm:$0xff]   ;;  %v1165_v51 = vld [vmem:[%s1588_s3 + $0x160] ss:$16 sps:$4 sm:$0xff]  }
  0x12   :  { %516 = vmatprep.subr.bf16.mxu1 %v1118_v21  ;;  %v1162_v52 = vld [vmem:[%s1588_s3 + $0x168] ss:$16 sps:$4 sm:$0xff]   ;;  %v1166_v53 = vld [vmem:[%s1588_s3 + $0x184] ss:$16 sps:$4 sm:$0xff]   ;;  %v1170_v54 = vld [vmem:[%s1588_s3 + $0x18c] ss:$16 sps:$4 sm:$0xff]  }
  0x13   :  { %556 = vmatpush1.bf16.msra.mxu0 %v1114_v19  ;;  %v1171_v55 = vld [vmem:[%s1588_s3 + $0x180] ss:$16 sps:$4 sm:$0xff]   ;;  %v1168_v56 = vld [vmem:[%s1588_s3 + $0x188] ss:$16 sps:$4 sm:$0xff]   ;;  %v1172_v57 = vld [vmem:[%s1588_s3 + $0x1a4] ss:$16 sps:$4 sm:$0xff]  }
  0x14   :  { %557 = vmatprep.subr.bf16.mxu0 %v1122_v22  ;;  %v1176_v58 = vld [vmem:[%s1588_s3 + $0x1ac] ss:$16 sps:$4 sm:$0xff]   ;;  %v1177_v59 = vld [vmem:[%s1588_s3 + $0x1a0] ss:$16 sps:$4 sm:$0xff]   ;;  %v1174_v60 = vld [vmem:[%s1588_s3 + $0x1a8] ss:$16 sps:$4 sm:$0xff]  }
  0x15   :  { %517 = vmatpush1.bf16.msra.mxu1 %v1123_v23  ;;  %v1178_v61 = vld [vmem:[%s1588_s3 + $0x1c4] ss:$16 sps:$4 sm:$0xff]   ;;  %v1182_v62 = vld [vmem:[%s1588_s3 + $0x1cc] ss:$16 sps:$4 sm:$0xff]   ;;  %v1180_v63 = vld [vmem:[%s1588_s3 + $0x1c8] ss:$16 sps:$4 sm:$0xff]  }
  0x16   :  { %518 = vmatprep.subr.bf16.mxu1 %v1124_v25  ;;  %v1183_v0 = vld [vmem:[%s1588_s3 + $0x1c0] ss:$16 sps:$4 sm:$0xff]   ;;  %v1184_v1 = vld [vmem:[%s1588_s3 + $0x1e4] ss:$16 sps:$4 sm:$0xff]   ;;  %v1188_v2 = vld [vmem:[%s1588_s3 + $0x1ec] ss:$16 sps:$4 sm:$0xff]  }
  0x17   :  { %558 = vmatpush1.bf16.msra.mxu0 %v1120_v24  ;;  %v1186_v3 = vld [vmem:[%s1588_s3 + $0x1e8] ss:$16 sps:$4 sm:$0xff]   ;;  %v1189_v4 = vld [vmem:[%s1588_s3 + $0x1e0] ss:$16 sps:$4 sm:$0xff]   ;;  %v1470_v8 = vshrl.u32 %v33_v7, 7 }
  0x18   :  { %559 = vmatprep.subr.bf16.mxu0 %v1128_v26  ;;  %v1190_v5 = vld [vmem:[%s1589_s5 + $0x40] sm:$0xff]   ;;  %v1194_v26 = vld [vmem:[%s1589_s5 + $0x48] sm:$0xff]  }
  0x19   :  { %519 = vmatpush1.bf16.msra.mxu1 %v1129_v28  ;;  %v1191_v6 = vld [vmem:[%s1589_s5 + $0xc0] sm:$0xff]   ;;  %v35_v9 = vsub.s32 0, %v1470_v8  ;;  %v39_v11 = vsub.s32 1, %v1470_v8  ;;  %v1196_v28 = vld [vmem:[%s1589_s5 + $0x8] sm:$0xff]  }
  0x1a   :  { %520 = vmatprep.subr.bf16.mxu1 %v1130_v29  ;;  %v31_v10 = vld [vmem:[%s1590_s2] sm:$0x3]  ;;  %v1197_v29 = vld [vmem:[%s1589_s5 + $0x88] sm:$0xff]  }
  0x1b   :  { %560 = vmatpush1.bf16.msra.mxu0 %v1126_v27  ;;  %v36_v12 = vrot.slane %v31_v10, %v35_v9  ;;  %v40_v13 = vrot.slane %v31_v10, %v39_v11  ;;  %v1192_v23 = vld [vmem:[%s1589_s5] sm:$0xff]   ;;  %v1195_v27 = vld [vmem:[%s1589_s5 + $0xc8] sm:$0xff]  }
  0x1c   :  { %561 = vmatprep.subr.bf16.mxu0 %v1134_v30  ;;  %v1193_v24 = vld [vmem:[%s1589_s5 + $0x80] sm:$0xff]   ;;  %v1198_v30 = vld [vmem:[%s1589_s5 + $0x50] sm:$0xff]  }
  0x1d   :  { %521 = vmatpush1.bf16.msra.mxu1 %v1135_v31  ;;  %v1199_v31 = vld [vmem:[%s1589_s5 + $0xd0] sm:$0xff]  }
  0x1e   :  { %522 = vmatprep.subr.bf16.mxu1 %v1136_v33  ;;  %v1201_v33 = vld [vmem:[%s1589_s5 + $0x90] sm:$0xff]  }
  0x1f   :  { %562 = vmatpush1.bf16.msra.mxu0 %v1132_v32  ;;  %v1200_v32 = vld [vmem:[%s1589_s5 + $0x10] sm:$0xff]  }
  0x20   :  { %563 = vmatprep.subr.bf16.mxu0 %v1140_v34  ;;  %v1202_v34 = vld [vmem:[%s1589_s5 + $0x58] sm:$0xff]  }
  0x21   :  { %523 = vmatpush1.bf16.msra.mxu1 %v1141_v36  ;;  %v1204_v36 = vld [vmem:[%s1589_s5 + $0x18] sm:$0xff]  }
  0x22   :  { %524 = vmatprep.subr.bf16.mxu1 %v1142_v37  ;;  %v1205_v37 = vld [vmem:[%s1589_s5 + $0x98] sm:$0xff]  }
  0x23   :  { %564 = vmatpush1.bf16.msra.mxu0 %v1138_v35  ;;  %v1203_v35 = vld [vmem:[%s1589_s5 + $0xd8] sm:$0xff]  }
  0x24   :  { %565 = vmatprep.subr.bf16.mxu0 %v1146_v38  ;;  %v1206_v38 = vld [vmem:[%s1589_s5 + $0x60] sm:$0xff]  }
  0x25   :  { %525 = vmatpush1.bf16.msra.mxu1 %v1147_v39  ;;  %v1207_v39 = vld [vmem:[%s1589_s5 + $0xe0] sm:$0xff]  }
  0x26   :  { %526 = vmatprep.subr.bf16.mxu1 %v1148_v41  ;;  %v1209_v41 = vld [vmem:[%s1589_s5 + $0xa0] sm:$0xff]  }
  0x27   :  { %566 = vmatpush1.bf16.msra.mxu0 %v1144_v40  ;;  %v1208_v40 = vld [vmem:[%s1589_s5 + $0x20] sm:$0xff]  }
  0x28   :  { %567 = vmatprep.subr.bf16.mxu0 %v1152_v42  ;;  %v1210_v42 = vld [vmem:[%s1589_s5 + $0x68] sm:$0xff]  }
  0x29   :  { %527 = vmatpush1.bf16.msra.mxu1 %v1153_v44  ;;  %v1212_v44 = vld [vmem:[%s1589_s5 + $0x28] sm:$0xff]  }
  0x2a   :  { %528 = vmatprep.subr.bf16.mxu1 %v1154_v45  ;;  %v1213_v45 = vld [vmem:[%s1589_s5 + $0xa8] sm:$0xff]  }
  0x2b   :  { %568 = vmatpush1.bf16.msra.mxu0 %v1150_v43  ;;  %v1211_v43 = vld [vmem:[%s1589_s5 + $0xe8] sm:$0xff]  }
  0x2c   :  { %569 = vmatprep.subr.bf16.mxu0 %v1158_v46  ;;  %v1214_v46 = vld [vmem:[%s1589_s5 + $0x70] sm:$0xff]  }
  0x2d   :  { %529 = vmatpush1.bf16.msra.mxu1 %v1159_v47  ;;  %v1215_v47 = vld [vmem:[%s1589_s5 + $0xf0] sm:$0xff]  }
  0x2e   :  { %530 = vmatprep.subr.bf16.mxu1 %v1160_v49  ;;  %v1217_v49 = vld [vmem:[%s1589_s5 + $0xb0] sm:$0xff]  }
  0x2f   :  { %570 = vmatpush1.bf16.msra.mxu0 %v1156_v48  ;;  %v1216_v48 = vld [vmem:[%s1589_s5 + $0x30] sm:$0xff]  }
  0x30   :  { %571 = vmatprep.subr.bf16.mxu0 %v1164_v50  ;;  %v1218_v50 = vld [vmem:[%s1589_s5 + $0x78] sm:$0xff]  }
  0x31   :  { %531 = vmatpush1.bf16.msra.mxu1 %v1165_v51  ;;  %v1219_v51 = vld [vmem:[%s1589_s5 + $0xf8] sm:$0xff]  }
  0x32   :  { %532 = vmatprep.subr.bf16.mxu1 %v1166_v53  ;;  %v1221_v53 = vld [vmem:[%s1589_s5 + $0xb8] sm:$0xff]  }
  0x33   :  { %572 = vmatpush1.bf16.msra.mxu0 %v1162_v52  ;;  %v1220_v52 = vld [vmem:[%s1589_s5 + $0x38] sm:$0xff]  }
  0x34   :  { %573 = vmatprep.subr.bf16.mxu0 %v1170_v54  ;;  %v178_v54 = vsub.s32 2, %v1470_v8 }
  0x35   :  { %533 = vmatpush1.bf16.msra.mxu1 %v1171_v55  ;;  %v166_v55 = vld [vmem:[%s1591_s4] sm:$0xf] }
  0x36   :  { %534 = vmatprep.subr.bf16.mxu1 %v1172_v57  ;;  %v171_v57 = vrot.slane %v166_v55, %v35_v9 }
  0x37   :  { %574 = vmatpush1.bf16.msra.mxu0 %v1168_v56  ;;  %v182_v56 = vsub.s32 3, %v1470_v8 }
  0x38   :  { %575 = vmatprep.subr.bf16.mxu0 %v1176_v58  ;;  %v179_v58 = vrot.slane %v166_v55, %v178_v54 }
  0x39   :  { %535 = vmatpush1.bf16.msra.mxu1 %v1177_v59  ;;  %v175_v59 = vrot.slane %v166_v55, %v39_v11 }
  0x3a   :  { %536 = vmatprep.subr.bf16.mxu1 %v1178_v61 }
  0x3b   :  { %576 = vmatpush1.bf16.msra.mxu0 %v1174_v60  ;;  %v183_v60 = vrot.slane %v166_v55, %v182_v56 }
  0x3c   :  { %577 = vmatprep.subr.bf16.mxu0 %v1182_v62 }
  0x3d   :  { %537 = vmatpush1.bf16.msra.mxu1 %v1183_v0 }
  0x3e   :  { %538 = vmatprep.subr.bf16.mxu1 %v1184_v1 }
  0x3f   :  { %578 = vmatpush1.bf16.msra.mxu0 %v1180_v63 }
  0x40   :  { %579 = vmatprep.subr.bf16.mxu0 %v1188_v2 }
  0x41   :  { %539 = vmatpush1.bf16.msra.mxu1 %v1189_v4 }
  0x42   :  { %1046 = vmatprep.subr.bf16.mxu1 %v1190_v5 }
  0x43   :  { %580 = vmatpush1.bf16.msra.mxu0 %v1186_v3 }
  0x44   :  { %1068 = vmatprep.subr.bf16.mxu0 %v1191_v6 }
  0xd9   :  { %v91_v14 = vpop.f32.mrb[0].mxu0 }
  0xda   :  { %v92_v15 = vadd.f32 %v91_v14, %v36_v12  ;;  %v93_v16 = vpop.f32.mrb[1].mxu0 }
  0xdb   :  { %v94_v17 = vadd.f32 %v93_v16, %v40_v13  ;;  %v95_v18 = vpop.f32.mrb[2].mxu0 }
  0xdc   :  { %v98_v19 = vmax.f32 %v92_v15, 0.0  ;;  %v96_v20 = vpop.f32.mrb[3].mxu0 }
  0xdd   :  { %v99_v21 = vmax.f32 %v94_v17, 0.0 }
  0xde   :  { %v100_v25 = vpack.c.bf16 %v98_v19, %v98_v19  ;;  %v1013_v19 = vld [vmem:[%s1592_s6] ss:$0 sm:$0xff] }
  0xdf   :  { %v101_v22 = vpack.c.bf16 %v99_v21, %v99_v21 }
  0xe1   :  { %540 = vmatprep.mubr.bf16.mxu1 %v101_v22  ;;  %581 = vmatprep.mubr.bf16.mxu0 %v101_v22 }
  0xe2   :  { %541 = vmatmul.mubr.bf16.vlgmr.msra.gmra.mrb[0].mxu1 %v100_v25  ;;  %582 = vmatmul.mubr.bf16.vlgmr.msra.gmra.mrb[4].mxu0 %v100_v25 }
  0xe3   :  { %1047 = vmatpush3.bf16.msra.mxu1 %v1192_v23  ;;  %1069 = vmatpush3.bf16.msra.mxu0 %v1193_v24 }
  0xe4   :  { %1048 = vmatprep.subr.bf16.mxu1 %v1194_v26  ;;  %1070 = vmatprep.subr.bf16.mxu0 %v1195_v27 }
  0xe7   :  { %1049 = vmatpush3.bf16.msra.mxu1 %v1196_v28  ;;  %1071 = vmatpush3.bf16.msra.mxu0 %v1197_v29 }
  0xe8   :  { %1050 = vmatprep.subr.bf16.mxu1 %v1198_v30  ;;  %1072 = vmatprep.subr.bf16.mxu0 %v1199_v31 }
  0xeb   :  { %1051 = vmatpush3.bf16.msra.mxu1 %v1200_v32  ;;  %1073 = vmatpush3.bf16.msra.mxu0 %v1201_v33 }
  0xec   :  { %1052 = vmatprep.subr.bf16.mxu1 %v1202_v34  ;;  %1074 = vmatprep.subr.bf16.mxu0 %v1203_v35 }
  0xef   :  { %1053 = vmatpush3.bf16.msra.mxu1 %v1204_v36  ;;  %1075 = vmatpush3.bf16.msra.mxu0 %v1205_v37 }
  0xf0   :  { %1054 = vmatprep.subr.bf16.mxu1 %v1206_v38  ;;  %1076 = vmatprep.subr.bf16.mxu0 %v1207_v39 }
  0xf3   :  { %1055 = vmatpush3.bf16.msra.mxu1 %v1208_v40  ;;  %1077 = vmatpush3.bf16.msra.mxu0 %v1209_v41 }
  0xf4   :  { %1056 = vmatprep.subr.bf16.mxu1 %v1210_v42  ;;  %1078 = vmatprep.subr.bf16.mxu0 %v1211_v43 }
  0xf7   :  { %1057 = vmatpush3.bf16.msra.mxu1 %v1212_v44  ;;  %1079 = vmatpush3.bf16.msra.mxu0 %v1213_v45 }
  0xf8   :  { %1058 = vmatprep.subr.bf16.mxu1 %v1214_v46  ;;  %1080 = vmatprep.subr.bf16.mxu0 %v1215_v47 }
  0xfb   :  { %1059 = vmatpush3.bf16.msra.mxu1 %v1216_v48  ;;  %1081 = vmatpush3.bf16.msra.mxu0 %v1217_v49 }
  0xfc   :  { %1060 = vmatprep.subr.bf16.mxu1 %v1218_v50  ;;  %1082 = vmatprep.subr.bf16.mxu0 %v1219_v51 }
  0xff   :  { %1061 = vmatpush3.bf16.msra.mxu1 %v1220_v52  ;;  %1083 = vmatpush3.bf16.msra.mxu0 %v1221_v53 }
 0x1b5   :  { %v542_v61 = vpop.f32.mrb[0].mxu1  ;;  %v583_v62 = vpop.f32.mrb[4].mxu0 }
 0x1b6   :  { %v543_v63 = vadd.f32 %v542_v61, %v171_v57  ;;  %v584_v0 = vadd.f32 %v583_v62, %v179_v58  ;;  %v544_v1 = vpop.f32.mrb[1].mxu1  ;;  %v585_v2 = vpop.f32.mrb[5].mxu0 }
 0x1b7   :  { %v545_v3 = vadd.f32 %v544_v1, %v175_v59  ;;  %v586_v4 = vadd.f32 %v585_v2, %v183_v60  ;;  %v546_v5 = vpop.f32.mrb[2].mxu1  ;;  %v587_v6 = vpop.f32.mrb[6].mxu0 }
 0x1b8   :  { %v590_v7 = vmax.f32 %v543_v63, 0.0  ;;  %v592_v10 = vmax.f32 %v584_v0, 0.0  ;;  %v547_v12 = vpop.f32.mrb[3].mxu1  ;;  %v588_v13 = vpop.f32.mrb[7].mxu0 }
 0x1b9   :  { %v591_v9 = vmax.f32 %v545_v3, 0.0  ;;  %v593_v14 = vmax.f32 %v586_v4, 0.0 }
 0x1ba   :  { %v594_v11 = vpack.c.bf16 %v590_v7, %v590_v7  ;;  %v596_v16 = vpack.c.bf16 %v592_v10, %v592_v10 }
 0x1bb   :  { %v595_v15 = vpack.c.bf16 %v591_v9, %v591_v9  ;;  %v597_v8 = vpack.c.bf16 %v593_v14, %v593_v14 }
 0x1bd   :  { %893 = vmatprep.mubr.bf16.mxu1 %v595_v15  ;;  %933 = vmatprep.mubr.bf16.mxu0 %v597_v8 }
 0x1be   :  { %894 = vmatmul.mubr.bf16.vlgmr.msra.gmra.mrb[4].mxu1 %v594_v11  ;;  %934 = vmatmul.mubr.bf16.vlgmr.msra.gmra.mrb[8].mxu0 %v596_v16 }
 0x291   :  { %v1062_v17 = vpop.f32.mrb[4].mxu1  ;;  %v1084_v18 = vpop.f32.mrb[8].mxu0 }
 0x292   :  { %v1063_v20 = vpop.f32.mrb[5].mxu1  ;;  %v1085_v21 = vpop.f32.mrb[9].mxu0 }
 0x293   :  { %v1064_v22 = vadd.f32 %v1063_v20, %v1062_v17  ;;  %v1086_v23 = vadd.f32 %v1085_v21, %v1084_v18  ;;  %v1065_v24 = vpop.f32.mrb[6].mxu1  ;;  %v1087_v25 = vpop.f32.mrb[10].mxu0 }
 0x294   :  { %v1066_v26 = vpop.f32.mrb[7].mxu1  ;;  %v1088_v27 = vpop.f32.mrb[11].mxu0 }
 0x295   :  { %v896_v28 = vadd.f32 %v1064_v22, %v1013_v19 }
 0x297   :  { %v936_v29 = vadd.f32 %v1086_v23, %v896_v28 }
 0x299   :  { %941 = vst [vmem:[%s1593_s7] sm:$0xff] %v936_v29 }

</bundles_post_ra>
